<compile_context>
chip_gen: v5e
topology: v5e:2x2
jax: 0.10.0
libtpu: 0.0.40
codegen_flags: <defaults>
</compile_context>

<pallas_src>
import functools
import math

import jax
import jax.numpy as jnp
import numpy as np
from jax.experimental import pallas as pl
from jax.experimental.pallas import tpu as pltpu


def _round_up(x, m):
    return (x + m - 1) // m * m


def _lade_kernel(y_ref, t_ref, shift_ref, w_ref, o_ref,
                 cnt_ref, sum_ref, m_ref, l_ref, *,
                 n_total, c_total, tile_n, tile_c, log_n, remine_lambda):
    """One (class-tile, sample-tile) step of the LADE forward.

    y_ref:     (tile_n, tile_c)  logits tile (native dtype; f32 math in-kernel)
    t_ref:     (tile_n, 1)       int32 targets
    shift_ref: (1, tile_c)       log(balanced_prior + 1e-9) - log(prior + 1e-9)
    w_ref:     (1, tile_c)       per-class weight (== prior)
    o_ref:     (1, tile_c)       per-class contribution  -(estim_loss * weight)
    cnt/sum/m/l_ref: (1, tile_c) f32 running accumulators (persist across N steps)
    """
    c_idx = pl.program_id(0)
    n_idx = pl.program_id(1)
    last_n = pl.num_programs(1) - 1

    # --- init running accumulators at the start of each class tile ---
    @pl.when(n_idx == 0)
    def _():
        cnt_ref[...] = jnp.zeros_like(cnt_ref)
        sum_ref[...] = jnp.zeros_like(sum_ref)
        m_ref[...] = jnp.full_like(m_ref, -jnp.inf)
        l_ref[...] = jnp.zeros_like(l_ref)

    y = y_ref[...].astype(jnp.float32)                     # (tile_n, tile_c)
    t = t_ref[...]                                         # (tile_n, 1) int32

    # Ragged last N tile: rows past n_total are garbage -> mask them out.
    row_ids = n_idx * tile_n + jax.lax.broadcasted_iota(
        jnp.int32, (tile_n, 1), 0)
    row_valid = row_ids < n_total                          # (tile_n, 1) bool

    # Global class id of each lane in this tile; single boolean predicate.
    cls_ids = c_idx * tile_c + jax.lax.broadcasted_iota(
        jnp.int32, (tile_n, tile_c), 1)
    eq = jnp.logical_and(t == cls_ids, row_valid)          # (tile_n, tile_c)

    cnt_ref[...] += jnp.sum(eq.astype(jnp.float32), axis=0, keepdims=True)
    sum_ref[...] += jnp.sum(jnp.where(eq, y, 0.0), axis=0, keepdims=True)

    # Online logsumexp over samples of x_q = y - log(prior) + log(bal_prior).
    x_q = jnp.where(row_valid, y + shift_ref[...], -jnp.inf)
    m_old = m_ref[...]
    m_new = jnp.maximum(m_old, jnp.max(x_q, axis=0, keepdims=True))
    l_ref[...] = (l_ref[...] * jnp.exp(m_old - m_new)
                  + jnp.sum(jnp.exp(x_q - m_new), axis=0, keepdims=True))
    m_ref[...] = m_new

    # --- finalize on the last N step; mask ragged class lanes (>= C) ---
    @pl.when(n_idx == last_n)
    def _():
        first = sum_ref[...] / (cnt_ref[...] + 1e-8)       # exact divide, (1,TC)
        second = m_ref[...] + jnp.log(l_ref[...]) - log_n
        estim = first - second - remine_lambda * second * second
        lane_valid = (c_idx * tile_c + jax.lax.broadcasted_iota(
            jnp.int32, (1, tile_c), 1)) < c_total
        # jnp.where (not multiply) so garbage Inf/NaN in padded lanes cannot leak.
        o_ref[...] = jnp.where(lane_valid, -(estim * w_ref[...]), 0.0)


def _select_tiles(N, C, itemsize, tile_n=None, tile_c=None):
    # Class tiles: lane-aligned; prefer >=2 tiles when C spans more than one
    # 128-lane group so dimension_semantics "parallel" can shard across the
    # two TensorCores on v7x. Cap at 512 lanes (measured ~85% HBM roofline).
    if tile_c is None:
        tile_c = _round_up(C, 128)
        if tile_c > 128:
            tile_c = min(tile_c, _round_up(pl.cdiv(C, 2), 128))
        tile_c = min(tile_c, 512)
    else:
        tile_c = min(_round_up(tile_c, 128), _round_up(C, 128))

    # N tiles: keep the double-buffered logits block <= ~4 MiB/buffer and the
    # lane-padded (tile_n, 1)->(tile_n, 128) target buffer <= ~1 MiB/buffer.
    if tile_n is None:
        budget = 4 * 1024 * 1024
        max_rows = (budget // (tile_c * itemsize)) // 8 * 8
        max_rows = max(8, min(max_rows, 2048))
        tile_n = N if N <= max_rows else max_rows
    else:
        tile_n = min(N, _round_up(tile_n, 8))
    return tile_n, tile_c


def lade_loss(y_pred, target, cls_num_list, remine_lambda=0.1,
              tile_n=None, tile_c=None):
    """y_pred: (N, C) float32/bfloat16, target: (N,) int, cls_num_list: (C,)."""
    N, C = y_pred.shape
    img_num = jnp.asarray(cls_num_list, jnp.float32)
    prior = img_num / jnp.sum(img_num)                     # (C,)
    cls_weight = prior                                     # identical in the module
    balanced_prior = 1.0 / C
    log_shift = (jnp.float32(math.log(balanced_prior + 1e-9))
                 - jnp.log(prior + 1e-9))                  # (C,)

    log_shift = log_shift.reshape(1, C).astype(jnp.float32)
    cls_weight = cls_weight.reshape(1, C).astype(jnp.float32)
    target2d = target.astype(jnp.int32).reshape(N, 1)

    itemsize = np.dtype(y_pred.dtype).itemsize
    tile_n, tile_c = _select_tiles(N, C, itemsize, tile_n, tile_c)
    num_c_tiles = pl.cdiv(C, tile_c)
    num_n_tiles = pl.cdiv(N, tile_n)

    kernel = functools.partial(
        _lade_kernel, n_total=N, c_total=C, tile_n=tile_n, tile_c=tile_c,
        log_n=float(math.log(N)), remine_lambda=float(remine_lambda))

    cost = pl.CostEstimate(
        flops=8 * N * C,
        transcendentals=N * C,
        bytes_accessed=N * C * itemsize + N * 4 + 3 * C * 4)

    per_cls = pl.pallas_call(
        kernel,
        out_shape=jax.ShapeDtypeStruct((1, C), jnp.float32),
        grid_spec=pltpu.PrefetchScalarGridSpec(
            num_scalar_prefetch=0,
            grid=(num_c_tiles, num_n_tiles),
            in_specs=[
                pl.BlockSpec((tile_n, tile_c), lambda c, n: (n, c)),  # logits
                pl.BlockSpec((tile_n, 1), lambda c, n: (n, 0)),       # targets
                pl.BlockSpec((1, tile_c), lambda c, n: (0, c)),       # log shift
                pl.BlockSpec((1, tile_c), lambda c, n: (0, c)),       # class weight
            ],
            out_specs=pl.BlockSpec((1, tile_c), lambda c, n: (0, c)),
            scratch_shapes=[pltpu.VMEM((1, tile_c), jnp.float32)] * 4,
        ),
        compiler_params=pltpu.CompilerParams(
            dimension_semantics=("parallel", "arbitrary"),
            vmem_limit_bytes=32 * 1024 * 1024),
        cost_estimate=cost,
    )(y_pred, target2d, log_shift, cls_weight)

    return jnp.sum(per_cls)


def lade_loss_ref(y_pred, target, cls_num_list, remine_lambda=0.1):
    """Pure-JAX reference mirroring the PyTorch module."""
    N, C = y_pred.shape
    y_pred = y_pred.astype(jnp.float32)
    img_num_per_cls = jnp.asarray(cls_num_list, jnp.float32)
    prior = img_num_per_cls / jnp.sum(img_num_per_cls)
    balanced_prior = 1.0 / C
    cls_weight = img_num_per_cls / jnp.sum(img_num_per_cls)

    mask = (target[None, :] == jnp.arange(C)[:, None]).astype(jnp.float32)  # (C, N)
    per_cls_pred_spread = y_pred.T * mask                                    # (C, N)
    pred_spread = (y_pred - jnp.log(prior + 1e-9)
                   + jnp.log(balanced_prior + 1e-9)).T                       # (C, N)
    num_samples_per_cls = jnp.sum(mask, axis=-1)                             # (C,)

    first = jnp.sum(per_cls_pred_spread, -1) / (num_samples_per_cls + 1e-8)
    second = jax.scipy.special.logsumexp(pred_spread, axis=-1) - np.log(N)
    estim = first - second - remine_lambda * second ** 2
    return -jnp.sum(estim * cls_weight)


if __name__ == "__main__":
    key = jax.random.PRNGKey(0)

    # --- Test 1: small shape matching the module (N=16, C=4), f32. ---
    N, C = 16, 4
    k1, k2, k3 = jax.random.split(key, 3)
    y_pred = jax.random.normal(k1, (N, C), jnp.float32)
    target = jax.random.randint(k2, (N,), 0, C, jnp.int32)
    cls_num_list = [40.0, 30.0, 20.0, 10.0]

    loss = jax.block_until_ready(lade_loss(y_pred, target, cls_num_list))
    ref = jax.block_until_ready(lade_loss_ref(y_pred, target, cls_num_list))
    assert np.allclose(np.asarray(loss), np.asarray(ref), rtol=2e-3, atol=2e-3), \
        (loss, ref)

    # --- Test 2: 2 class tiles, ragged last class tile, no y_pred padding. ---
    N2, C2 = 32, 300
    k4, k5, k6 = jax.random.split(k3, 3)
    y_pred2 = jax.random.normal(k4, (N2, C2), jnp.float32)
    target2 = jax.random.randint(k5, (N2,), 0, C2, jnp.int32)
    cls_num_list2 = np.arange(C2, 0, -1).astype(np.float32)

    loss2 = jax.block_until_ready(lade_loss(y_pred2, target2, cls_num_list2))
    ref2 = jax.block_until_ready(lade_loss_ref(y_pred2, target2, cls_num_list2))
    assert np.allclose(np.asarray(loss2), np.asarray(ref2), rtol=2e-3, atol=2e-3), \
        (loss2, ref2)

    # --- Test 3: tiled N axis (online logsumexp), ragged N and C tiles. ---
    N3, C3 = 40, 260
    k7, k8 = jax.random.split(k6)
    y_pred3 = jax.random.normal(k7, (N3, C3), jnp.float32)
    target3 = jax.random.randint(k8, (N3,), 0, C3, jnp.int32)
    cls_num_list3 = np.linspace(100.0, 1.0, C3).astype(np.float32)

    loss3 = jax.block_until_ready(
        lade_loss(y_pred3, target3, cls_num_list3, tile_n=16, tile_c=128))
    ref3 = jax.block_until_ready(lade_loss_ref(y_pred3, target3, cls_num_list3))
    assert np.allclose(np.asarray(loss3), np.asarray(ref3), rtol=2e-3, atol=2e-3), \
        (loss3, ref3)

    # --- Test 4: bf16 ingestion (native-dtype HBM read, f32 in-kernel math). ---
    loss_bf16 = jax.block_until_ready(
        lade_loss(y_pred.astype(jnp.bfloat16), target, cls_num_list))
    assert np.allclose(np.asarray(loss_bf16), np.asarray(ref),
                       rtol=0.1, atol=0.1), (loss_bf16, ref)

    print("KERNEL_OK")
</pallas_src>

<mosaic_0001>
module attributes {stable_mosaic.version = 11 : i64} {
  func.func @_lade_kernel(%arg0: i32, %arg1: i32, %arg2: memref<16x128xf32, #tpu.memory_space<vmem>>, %arg3: memref<16x1xi32, #tpu.memory_space<vmem>>, %arg4: memref<1x128xf32, #tpu.memory_space<vmem>>, %arg5: memref<1x128xf32, #tpu.memory_space<vmem>>, %arg6: memref<1x128xf32, #tpu.memory_space<vmem>>, %arg7: memref<1x128xf32, #tpu.memory_space<vmem>>, %arg8: memref<1x128xf32, #tpu.memory_space<vmem>>, %arg9: memref<1x128xf32, #tpu.memory_space<vmem>>, %arg10: memref<1x128xf32, #tpu.memory_space<vmem>>) attributes {dimension_semantics = [#tpu.dimension_semantics<parallel>, #tpu.dimension_semantics<arbitrary>], iteration_bounds = array<i64: 1, 1>, scalar_prefetch = 0 : i64, scratch_operands = 4 : i64, tpu.core_type = #tpu.core_type<tc>, window_params = [{transform_indices = @transform_0, window_bounds = array<i64: 16, 128>}, {transform_indices = @transform_1, window_bounds = array<i64: 16, 1>}, {transform_indices = @transform_2, window_bounds = array<i64: 1, 128>}, {transform_indices = @transform_3, window_bounds = array<i64: 1, 128>}, {transform_indices = @transform_4, window_bounds = array<i64: 1, 128>}]} {
    %c0_i32 = arith.constant 0 : i32
    %0 = arith.cmpi eq, %arg1, %c0_i32 : i32
    %1 = arith.extui %0 : i1 to i32
    %c0_i32_0 = arith.constant 0 : i32
    %2 = arith.cmpi ne, %1, %c0_i32_0 : i32
    scf.if %2 {
      %cst_30 = arith.constant 0.000000e+00 : f32
      %59 = vector.broadcast %cst_30 : f32 to vector<1x128xf32>
      %c0_31 = arith.constant 0 : index
      %c0_32 = arith.constant 0 : index
      %60 = vector.load %arg7[%c0_31, %c0_32] : memref<1x128xf32, #tpu.memory_space<vmem>>, vector<1x128xf32>
      tpu.vector_store %arg7[%c0_31, %c0_32], %59 {strides = array<i32>} : memref<1x128xf32, #tpu.memory_space<vmem>>, vector<1x128xf32>,
      %cst_33 = arith.constant 0.000000e+00 : f32
      %61 = vector.broadcast %cst_33 : f32 to vector<1x128xf32>
      %c0_34 = arith.constant 0 : index
      %c0_35 = arith.constant 0 : index
      %62 = vector.load %arg8[%c0_34, %c0_35] : memref<1x128xf32, #tpu.memory_space<vmem>>, vector<1x128xf32>
      tpu.vector_store %arg8[%c0_34, %c0_35], %61 {strides = array<i32>} : memref<1x128xf32, #tpu.memory_space<vmem>>, vector<1x128xf32>,
      %cst_36 = arith.constant 0xFF800000 : f32
      %63 = vector.broadcast %cst_36 : f32 to vector<1x128xf32>
      %c0_37 = arith.constant 0 : index
      %c0_38 = arith.constant 0 : index
      %64 = vector.load %arg9[%c0_37, %c0_38] : memref<1x128xf32, #tpu.memory_space<vmem>>, vector<1x128xf32>
      tpu.vector_store %arg9[%c0_37, %c0_38], %63 {strides = array<i32>} : memref<1x128xf32, #tpu.memory_space<vmem>>, vector<1x128xf32>,
      %cst_39 = arith.constant 0.000000e+00 : f32
      %65 = vector.broadcast %cst_39 : f32 to vector<1x128xf32>
      %c0_40 = arith.constant 0 : index
      %c0_41 = arith.constant 0 : index
      %66 = vector.load %arg10[%c0_40, %c0_41] : memref<1x128xf32, #tpu.memory_space<vmem>>, vector<1x128xf32>
      tpu.vector_store %arg10[%c0_40, %c0_41], %65 {strides = array<i32>} : memref<1x128xf32, #tpu.memory_space<vmem>>, vector<1x128xf32>,
    } else {
    }
    %c0 = arith.constant 0 : index
    %c0_1 = arith.constant 0 : index
    %3 = vector.load %arg2[%c0, %c0_1] : memref<16x128xf32, #tpu.memory_space<vmem>>, vector<16x128xf32>
    %c0_2 = arith.constant 0 : index
    %c0_3 = arith.constant 0 : index
    %4 = vector.load %arg3[%c0_2, %c0_3] : memref<16x1xi32, #tpu.memory_space<vmem>>, vector<16x1xi32>
    %c16_i32 = arith.constant 16 : i32
    %5 = arith.muli %arg1, %c16_i32 : i32
    %6 = tpu.iota {dimensions = array<i32: 0>} : vector<16x1xi32>
    %7 = vector.broadcast %5 : i32 to vector<16x1xi32>
    %8 = arith.addi %7, %6 : vector<16x1xi32>
    %c16_i32_4 = arith.constant 16 : i32
    %9 = vector.broadcast %c16_i32_4 : i32 to vector<16x1xi32>
    %10 = arith.cmpi slt, %8, %9 : vector<16x1xi32>
    %c128_i32 = arith.constant 128 : i32
    %11 = arith.muli %arg0, %c128_i32 : i32
    %12 = tpu.iota {dimensions = array<i32: 1>} : vector<16x128xi32>
    %13 = vector.broadcast %11 : i32 to vector<16x128xi32>
    %14 = arith.addi %13, %12 : vector<16x128xi32>
    %15 = vector.broadcast %4 : vector<16x1xi32> to vector<16x128xi32>
    %16 = arith.cmpi eq, %15, %14 : vector<16x128xi32>
    %17 = vector.broadcast %10 : vector<16x1xi1> to vector<16x128xi1>
    %18 = arith.andi %16, %17 : vector<16x128xi1>
    %c0_5 = arith.constant 0 : index
    %c0_6 = arith.constant 0 : index
    %19 = vector.load %arg7[%c0_5, %c0_6] : memref<1x128xf32, #tpu.memory_space<vmem>>, vector<1x128xf32>
    %20 = arith.extui %18 : vector<16x128xi1> to vector<16x128xi32>
    %21 = arith.sitofp %20 : vector<16x128xi32> to vector<16x128xf32>
    %cst = arith.constant dense<0.000000e+00> : vector<128xf32>
    %22 = vector.multi_reduction <add>, %21, %cst [0] : vector<16x128xf32> to vector<128xf32>
    %23 = vector.shape_cast %22 : vector<128xf32> to vector<1x128xf32>
    %24 = arith.addf %19, %23 : vector<1x128xf32>
    %c0_7 = arith.constant 0 : index
    %c0_8 = arith.constant 0 : index
    %25 = vector.load %arg7[%c0_7, %c0_8] : memref<1x128xf32, #tpu.memory_space<vmem>>, vector<1x128xf32>
    tpu.vector_store %arg7[%c0_7, %c0_8], %24 {strides = array<i32>} : memref<1x128xf32, #tpu.memory_space<vmem>>, vector<1x128xf32>,
    %c0_9 = arith.constant 0 : index
    %c0_10 = arith.constant 0 : index
    %26 = vector.load %arg8[%c0_9, %c0_10] : memref<1x128xf32, #tpu.memory_space<vmem>>, vector<1x128xf32>
    %cst_11 = arith.constant 0.000000e+00 : f32
    %27 = vector.broadcast %cst_11 : f32 to vector<16x128xf32>
    %28 = arith.select %18, %3, %27 : vector<16x128xi1>, vector<16x128xf32>
    %cst_12 = arith.constant dense<0.000000e+00> : vector<128xf32>
    %29 = vector.multi_reduction <add>, %28, %cst_12 [0] : vector<16x128xf32> to vector<128xf32>
    %30 = vector.shape_cast %29 : vector<128xf32> to vector<1x128xf32>
    %31 = arith.addf %26, %30 : vector<1x128xf32>
    %c0_13 = arith.constant 0 : index
    %c0_14 = arith.constant 0 : index
    %32 = vector.load %arg8[%c0_13, %c0_14] : memref<1x128xf32, #tpu.memory_space<vmem>>, vector<1x128xf32>
    tpu.vector_store %arg8[%c0_13, %c0_14], %31 {strides = array<i32>} : memref<1x128xf32, #tpu.memory_space<vmem>>, vector<1x128xf32>,
    %c0_15 = arith.constant 0 : index
    %c0_16 = arith.constant 0 : index
    %33 = vector.load %arg4[%c0_15, %c0_16] : memref<1x128xf32, #tpu.memory_space<vmem>>, vector<1x128xf32>
    %34 = vector.broadcast %33 : vector<1x128xf32> to vector<16x128xf32>
    %35 = arith.addf %3, %34 : vector<16x128xf32>
    %cst_17 = arith.constant 0xFF800000 : f32
    %36 = vector.shape_cast %10 : vector<16x1xi1> to vector<16x1xi1>
    %37 = vector.broadcast %36 : vector<16x1xi1> to vector<16x128xi1>
    %38 = vector.broadcast %cst_17 : f32 to vector<16x128xf32>
    %39 = arith.select %37, %35, %38 : vector<16x128xi1>, vector<16x128xf32>
    %c0_18 = arith.constant 0 : index
    %c0_19 = arith.constant 0 : index
    %40 = vector.load %arg9[%c0_18, %c0_19] : memref<1x128xf32, #tpu.memory_space<vmem>>, vector<1x128xf32>
    %cst_20 = arith.constant dense<0xFF800000> : vector<128xf32>
    %41 = vector.multi_reduction <maximumf>, %39, %cst_20 [0] : vector<16x128xf32> to vector<128xf32>
    %42 = vector.shape_cast %41 : vector<128xf32> to vector<1x128xf32>
    %43 = arith.maximumf %40, %42 : vector<1x128xf32>
    %c0_21 = arith.constant 0 : index
    %c0_22 = arith.constant 0 : index
    %44 = vector.load %arg10[%c0_21, %c0_22] : memref<1x128xf32, #tpu.memory_space<vmem>>, vector<1x128xf32>
    %45 = arith.subf %40, %43 : vector<1x128xf32>
    %46 = math.exp %45 : vector<1x128xf32>
    %47 = arith.mulf %44, %46 : vector<1x128xf32>
    %48 = vector.broadcast %43 : vector<1x128xf32> to vector<16x128xf32>
    %49 = arith.subf %39, %48 : vector<16x128xf32>
    %50 = math.exp %49 : vector<16x128xf32>
    %cst_23 = arith.constant dense<0.000000e+00> : vector<128xf32>
    %51 = vector.multi_reduction <add>, %50, %cst_23 [0] : vector<16x128xf32> to vector<128xf32>
    %52 = vector.shape_cast %51 : vector<128xf32> to vector<1x128xf32>
    %53 = arith.addf %47, %52 : vector<1x128xf32>
    %c0_24 = arith.constant 0 : index
    %c0_25 = arith.constant 0 : index
    %54 = vector.load %arg10[%c0_24, %c0_25] : memref<1x128xf32, #tpu.memory_space<vmem>>, vector<1x128xf32>
    tpu.vector_store %arg10[%c0_24, %c0_25], %53 {strides = array<i32>} : memref<1x128xf32, #tpu.memory_space<vmem>>, vector<1x128xf32>,
    %c0_26 = arith.constant 0 : index
    %c0_27 = arith.constant 0 : index
    %55 = vector.load %arg9[%c0_26, %c0_27] : memref<1x128xf32, #tpu.memory_space<vmem>>, vector<1x128xf32>
    tpu.vector_store %arg9[%c0_26, %c0_27], %43 {strides = array<i32>} : memref<1x128xf32, #tpu.memory_space<vmem>>, vector<1x128xf32>,
    %c0_i32_28 = arith.constant 0 : i32
    %56 = arith.cmpi eq, %arg1, %c0_i32_28 : i32
    %57 = arith.extui %56 : i1 to i32
    %c0_i32_29 = arith.constant 0 : i32
    %58 = arith.cmpi ne, %57, %c0_i32_29 : i32
    scf.if %58 {
      %c0_30 = arith.constant 0 : index
      %c0_31 = arith.constant 0 : index
      %59 = vector.load %arg8[%c0_30, %c0_31] : memref<1x128xf32, #tpu.memory_space<vmem>>, vector<1x128xf32>
      %c0_32 = arith.constant 0 : index
      %c0_33 = arith.constant 0 : index
      %60 = vector.load %arg7[%c0_32, %c0_33] : memref<1x128xf32, #tpu.memory_space<vmem>>, vector<1x128xf32>
      %cst_34 = arith.constant 9.99999993E-9 : f32
      %61 = vector.broadcast %cst_34 : f32 to vector<1x128xf32>
      %62 = arith.addf %60, %61 : vector<1x128xf32>
      %63 = arith.divf %59, %62 : vector<1x128xf32>
      %c0_35 = arith.constant 0 : index
      %c0_36 = arith.constant 0 : index
      %64 = vector.load %arg9[%c0_35, %c0_36] : memref<1x128xf32, #tpu.memory_space<vmem>>, vector<1x128xf32>
      %c0_37 = arith.constant 0 : index
      %c0_38 = arith.constant 0 : index
      %65 = vector.load %arg10[%c0_37, %c0_38] : memref<1x128xf32, #tpu.memory_space<vmem>>, vector<1x128xf32>
      %66 = math.log %65 : vector<1x128xf32>
      %67 = arith.addf %64, %66 : vector<1x128xf32>
      %cst_39 = arith.constant 2.77258873 : f32
      %68 = vector.broadcast %cst_39 : f32 to vector<1x128xf32>
      %69 = arith.subf %67, %68 : vector<1x128xf32>
      %70 = arith.subf %63, %69 : vector<1x128xf32>
      %cst_40 = arith.constant 1.000000e-01 : f32
      %71 = vector.broadcast %cst_40 : f32 to vector<1x128xf32>
      %72 = arith.mulf %71, %69 : vector<1x128xf32>
      %73 = arith.mulf %72, %69 : vector<1x128xf32>
      %74 = arith.subf %70, %73 : vector<1x128xf32>
      %c128_i32_41 = arith.constant 128 : i32
      %75 = arith.muli %arg0, %c128_i32_41 : i32
      %76 = tpu.iota {dimensions = array<i32: 1>} : vector<1x128xi32>
      %77 = vector.broadcast %75 : i32 to vector<1x128xi32>
      %78 = arith.addi %77, %76 : vector<1x128xi32>
      %c4_i32 = arith.constant 4 : i32
      %79 = vector.broadcast %c4_i32 : i32 to vector<1x128xi32>
      %80 = arith.cmpi slt, %78, %79 : vector<1x128xi32>
      %c0_42 = arith.constant 0 : index
      %c0_43 = arith.constant 0 : index
      %81 = vector.load %arg5[%c0_42, %c0_43] : memref<1x128xf32, #tpu.memory_space<vmem>>, vector<1x128xf32>
      %82 = arith.mulf %74, %81 : vector<1x128xf32>
      %cst_44 = arith.constant 0.000000e+00 : f32
      %83 = vector.broadcast %cst_44 : f32 to vector<1x128xf32>
      %84 = arith.subf %83, %82 : vector<1x128xf32>
      %cst_45 = arith.constant 0.000000e+00 : f32
      %85 = vector.broadcast %cst_45 : f32 to vector<1x128xf32>
      %86 = arith.select %80, %84, %85 : vector<1x128xi1>, vector<1x128xf32>
      %c0_46 = arith.constant 0 : index
      %c0_47 = arith.constant 0 : index
      %87 = vector.load %arg6[%c0_46, %c0_47] : memref<1x128xf32, #tpu.memory_space<vmem>>, vector<1x128xf32>
      tpu.vector_store %arg6[%c0_46, %c0_47], %86 {strides = array<i32>} : memref<1x128xf32, #tpu.memory_space<vmem>>, vector<1x128xf32>,
    } else {
    }
    return
  }
  func.func @transform_0(%arg0: i32, %arg1: i32) -> (i32, i32) {
    %c0_i32 = arith.constant 0 : i32
    return %arg1, %arg0 : i32, i32
  }
  func.func @transform_1(%arg0: i32, %arg1: i32) -> (i32, i32) {
    %c0_i32 = arith.constant 0 : i32
    %c0_i32_0 = arith.constant 0 : i32
    return %arg1, %c0_i32 : i32, i32
  }
  func.func @transform_2(%arg0: i32, %arg1: i32) -> (i32, i32) {
    %c0_i32 = arith.constant 0 : i32
    %c0_i32_0 = arith.constant 0 : i32
    return %c0_i32, %arg0 : i32, i32
  }
  func.func @transform_3(%arg0: i32, %arg1: i32) -> (i32, i32) {
    %c0_i32 = arith.constant 0 : i32
    %c0_i32_0 = arith.constant 0 : i32
    return %c0_i32, %arg0 : i32, i32
  }
  func.func @transform_4(%arg0: i32, %arg1: i32) -> (i32, i32) {
    %c0_i32 = arith.constant 0 : i32
    %c0_i32_0 = arith.constant 0 : i32
    return %c0_i32, %arg0 : i32, i32
  }
}

</mosaic_0001>

<bundles_post_ra>
// kernel: tpu_custom_call.1
= control target key start
LH: loop header
LB: loop body
LE: loop exit
PB: predicated region body
PF: predicated region fallthrough
CT: control target
= control target key end

     0   :  { %v223_v1 = vmov 0   ;;  %s278_s0 = inlined_call_operand.vmem [shape: f32[16,4], index: 0, kind: input, shape index: {}]   ;;  %s279_s1 = inlined_call_operand.vmem [shape: s32[16,1], index: 1, kind: input, shape index: {}]   ;;  %s280_s2 = inlined_call_operand.vmem [shape: f32[1,4], index: 2, kind: input, shape index: {}]   ;;  %s281_s3 = inlined_call_operand.vmem [shape: f32[1,4], index: 3, kind: input, shape index: {}]   ;;  %s282_s4 = inlined_call_operand.hbm [shape: f32[1,4], index: 4, kind: output, shape index: {}]  }
   0x1   :  { %v28_v0 = vld [vmem:[%s279_s1] sm:$0xff]  ;;  %185 = vset.pattern.permute.xlu0 %v223_v1 }
   0x2   :  { %9 = vsyncpa [#allocation7], 0  ;;  %45 = vperm.xlu0 %185, %v28_v0   ;;  %v29_v2 = vld [vmem:[%s279_s1 + $0x8] sm:$0xff]  ;;  %v186_v3 = vld [vmem:[%s280_s2] ss:$0 sm:$0xff]  ;;  %v224_v11 = vmov -inf   ;;  %v40_v37 = vlaneseq }
   0x3   :  { %v26_v4 = vld [vmem:[%s278_s0] sm:$0xff]  ;;  %v27_v5 = vld [vmem:[%s278_s0 + $0x8] sm:$0xff]  ;;  %24 = vst [vmem:[#allocation4] sm:$0x1] %v224_v11  ;;  %v225_v15 = vmov 0.0   ;;  %s226_s2 = smov [#allocation6]  }
   0x4   :  { %v88_v6 = vadd.f32 %v186_v3, %v26_v4  ;;  %v89_v7 = vadd.f32 %v186_v3, %v27_v5  ;;  %22 = vst [vmem:[#allocation2] sm:$0x1] %v225_v15  ;;  %v267_v41 = vand.u32 127, %v40_v37  ;;  %s167_s25 = sshll.u32 %s226_s2, 4  ;;  %s169_s28 = sshll.u32 %s282_s4, 4  ;;  %s168_s25 = int_to_ptr.vmem [resolvable:$true] %s167_s25  ;;  %s170_s28 = int_to_ptr.hbm [resolvable:$true] %s169_s28 }
   0x5   :  { %23 = vst [vmem:[#allocation3] sm:$0x1] %v225_v15 }
   0x6   :  { %v93_v8 = vmax.f32 %v88_v6, %v89_v7  ;;  %25 = vst [vmem:[#allocation5] sm:$0x1] %v225_v15  ;;  %vm156_vm6 = vcmp.lt.s32.totalorder %v267_v41, 4 }
   0x8   :  { %v94_v9 = vrot.slane %v93_v8, 4 }
   0xa   :  { %48 = vperm.xlu0 %185, %v29_v2   ;;  %v95_v10 = vmax.f32 %v93_v8, %v94_v9  ;;  %v92_v17 = vld [vmem:[#allocation4] sm:$0x1] }
   0xb   :  { %v58_v59 = vld [vmem:[#allocation2] sm:$0x1] }
   0xc   :  { %v96_v12 = vrot.slane %v95_v10, 2  ;;  %v72_v60 = vld [vmem:[#allocation3] sm:$0x1] }
   0xd   :  { %v101_v33 = vld [vmem:[#allocation5] sm:$0x1] }
   0xe   :  { %v97_v13 = vmax.f32 %v95_v10, %v96_v12 }
  0x10   :  { %v98_v14 = vrot.slane %v97_v13, 1 }
  0x12   :  { %v99_v16 = vmax.f32 %v97_v13, %v98_v14 }
  0x14   :  { %v100_v18 = vmax.f32 %v92_v17, %v99_v16 }
  0x16   :  { %v107_v19 = vperm.slane %v100_v18, 0  ;;  %124 = vst [vmem:[#allocation4] sm:$0x1] %v100_v18  ;;  %v102_v26 = vsub.f32 %v92_v17, %v100_v18 }
  0x18   :  { %v109_v20 = vsub.f32 %v88_v6, %v107_v19  ;;  %v110_v21 = vsub.f32 %v89_v7, %v107_v19  ;;  %v103_v28 = vmul.f32 1.442695, %v102_v26 }
  0x1a   :  { %v111_v22 = vmul.f32 1.442695, %v109_v20  ;;  %v113_v23 = vmul.f32 1.442695, %v110_v21 }
  0x1c   :  { %187 = vpow2.f32 %v111_v22 }
  0x1d   :  { %189 = vpow2.f32 %v113_v23  ;;  %v146_v6 = vld [vmem:[#allocation4] sm:$0x1] }
  0x1e   :  { %191 = vpow2.f32 %v103_v28 }
  0x22   :  { %v188_v24 = vpop.eup %187 }
  0x23   :  { %v190_v25 = vpop.eup %189 }
  0x24   :  { %v115_v27 = vadd.f32 %v190_v25, %v188_v24  ;;  %v192_v34 = vpop.eup %191  ;;  %v157_v24 = vld [vmem:[%s281_s3] sm:$0x1] }
  0x25   :  { %v105_v36 = vmul.f32 %v192_v34, %v101_v33 }
  0x26   :  { %v116_v29 = vrot.slane %v115_v27, 4 }
  0x28   :  { %v117_v30 = vadd.f32 %v116_v29, %v115_v27 }
  0x2a   :  { %v118_v31 = vrot.slane %v117_v30, 2 }
  0x2c   :  { %v119_v32 = vadd.f32 %v118_v31, %v117_v30 }
  0x2e   :  { %v120_v35 = vrot.slane %v119_v32, 1 }
  0x30   :  { %v121_v38 = vadd.f32 %v120_v35, %v119_v32 }
  0x32   :  { %v122_v40 = vadd.f32 %v121_v38, %v105_v36 }
  0x34   :  { %123 = vst [vmem:[#allocation5] sm:$0x1] %v122_v40 }
  0x3b   :  { %v147_v1 = vld [vmem:[#allocation5] sm:$0x1] }
  0x3c   :  { %193 = vlog2.f32 %v147_v1 }
  0x42   :  { %v194_v3 = vpop.eup %193 }
  0x74   :  { %v46_v39 = vpop.permute.xlu0 %45 }
  0x75   :  { %vm50_vm0 = vcmp.eq.s32.totalorder %v46_v39, %v267_v41 }
  0x76   :  { %v178_v43 = vsel %vm50_vm0, 1.0, %v225_v15  ;;  %v73_v44 = vsel %vm50_vm0, %v26_v4, 0.0 }
  0x7c   :  { %v49_v42 = vpop.permute.xlu0 %48 }
  0x7d   :  { %vm51_vm1 = vcmp.eq.s32.totalorder %v49_v42, %v267_v41 }
  0x7e   :  { %v179_v45 = vsel %vm51_vm1, 1.0, %v225_v15  ;;  %v74_v46 = vsel %vm51_vm1, %v27_v5, 0.0  ;;  %v149_v5 = vmul.f32 0.6931472, %v194_v3 }
  0x7f   :  { %v63_v47 = vadd.f32 %v179_v45, %v178_v43  ;;  %v75_v48 = vadd.f32 %v74_v46, %v73_v44 }
  0x80   :  { %v150_v7 = vadd.f32 %v149_v5, %v146_v6 }
  0x81   :  { %v64_v49 = vrot.slane %v63_v47, 4  ;;  %v76_v50 = vrot.slane %v75_v48, 4 }
  0x82   :  { %v180_v11 = vadd.f32 -2.7725887, %v150_v7 }
  0x83   :  { %v65_v51 = vadd.f32 %v64_v49, %v63_v47  ;;  %v77_v52 = vadd.f32 %v76_v50, %v75_v48 }
  0x84   :  { %v153_v16 = vmul.f32 0.1, %v180_v11 }
  0x85   :  { %v66_v53 = vrot.slane %v65_v51, 2  ;;  %v78_v54 = vrot.slane %v77_v52, 2 }
  0x86   :  { %v154_v22 = vmul.f32 %v180_v11, %v153_v16 }
  0x87   :  { %v67_v55 = vadd.f32 %v66_v53, %v65_v51  ;;  %v79_v56 = vadd.f32 %v78_v54, %v77_v52 }
  0x89   :  { %v68_v57 = vrot.slane %v67_v55, 1  ;;  %v80_v58 = vrot.slane %v79_v56, 1 }
  0x8b   :  { %v69_v61 = vadd.f32 %v68_v57, %v67_v55  ;;  %v81_v62 = vadd.f32 %v80_v58, %v79_v56 }
  0x8d   :  { %v70_v63 = vadd.f32 %v69_v61, %v58_v59  ;;  %v82_v0 = vadd.f32 %v81_v62, %v72_v60 }
  0x8f   :  { %71 = vst [vmem:[#allocation2] sm:$0x1] %v70_v63 }
  0x90   :  { %83 = vst [vmem:[#allocation3] sm:$0x1] %v82_v0 }
  0x96   :  { %v129_v2 = vld [vmem:[#allocation2] sm:$0x1] }
  0x97   :  { %v130_v4 = vadd.f32 1e-08, %v129_v2  ;;  %v128_v19 = vld [vmem:[#allocation3] sm:$0x1] }
  0x99   :  { %195 = vrcp.f32 %v130_v4  ;;  %v142_v12 = vand.u32 2147483648, %v130_v4  ;;  %v140_v14 = vand.u32 2147483647, %v130_v4  ;;  %vm136_vm3 = vweird.f32 %v130_v4 }
  0x9b   :  { %v143_v17 = vor.u32 1.1754944e-38, %v142_v12  ;;  %vm141_vm5 = vcmp.eq.f32.partialorder %v140_v14, 8.507059e+37 }
  0x9f   :  { %v196_v8 = vpop.eup %195 }
  0xa0   :  { %v132_v9 = vmul.f32 %v196_v8, %v130_v4  ;;  %vm137_vm2 = vweird.f32 %v196_v8 }
  0xa1   :  { %vm138_vm4 = vmor %vm136_vm3, %vm137_vm2 }
  0xa2   :  { %v133_v10 = vsub.f32 1.0, %v132_v9 }
  0xa4   :  { %v134_v13 = vmul.f32 %v196_v8, %v133_v10 }
  0xa6   :  { %v135_v15 = vadd.f32 %v196_v8, %v134_v13 }
  0xa8   :  { %v139_v18 = vsel %vm138_vm4, %v196_v8, %v135_v15 }
  0xa9   :  { %v144_v20 = vsel %vm141_vm5, %v143_v17, %v139_v18 }
  0xaa   :  { %v145_v21 = vmul.f32 %v144_v20, %v128_v19 }
  0xac   :  { %v152_v23 = vsub.f32 %v145_v21, %v180_v11 }
  0xae   :  { %v155_v25 = vsub.f32 %v152_v23, %v154_v22 }
  0xb0   :  { %v158_v26 = vmul.f32 %v157_v24, %v155_v25 }
  0xb2   :  { %v159_v27 = vsub.f32 0.0, %v158_v26 }
  0xb4   :  { %v160_v28 = vsel %vm156_vm6, %v159_v27, 0.0 }
  0xb5   :  { %161 = vst [vmem:[#allocation6] sm:$0x1] %v160_v28 }
  0xb6   :  { %172 = dma.vmem_to_hbm [thread:$0]  %s168_s25, 16, %s170_s28, [#allocation7]  }
  0xb7   :  { %221 = dma.done.wait [#allocation7], 16  }
  0xb8   :  { %222 = vsyncadd [#allocation7], 4294967280 }
  0xb9   :  { %177 = vsyncpa [#allocation7], 1 }

</bundles_post_ra>
